<compile_context>
chip_gen: v7x
topology: tpu7x:2x2x1
jax: 0.10.0
libtpu: 0.0.40
codegen_flags: <defaults>
</compile_context>

<pallas_src>
import numpy as np
import jax
import jax.numpy as jnp
from jax.experimental import pallas as pl
from jax.experimental.pallas import tpu as pltpu


def _round_up(a, b):
    return ((a + b - 1) // b) * b


def _choose_tile(n, max_tile):
    """Batch tile: one grid step for small batches; even step count otherwise."""
    n8 = _round_up(max(n, 8), 8)
    if n8 <= max_tile:
        return n8                                   # whole batch, 1 grid step
    # split into an even number of steps (>= 2) so both v7x TCs get balanced
    # work under dimension_semantics=("parallel",)
    pairs = pl.cdiv(pl.cdiv(n8, max_tile), 2)
    return max(8, _round_up(pl.cdiv(n8, 2 * pairs), 8))


# ----------------------------- Pallas kernel --------------------------------
def mlp_base_kernel(x_ref,
                    w1_ref, b1_ref,          # fused layer 1: (K, 2H), (1, 2H)
                    w2_ref, b2_ref,          # fused block-diag layer 2: (2H, 2H), (1, 2H)
                    vw_ref, vb_ref,          # value head: (1, 2H) (actor half = 0), (1, 1)
                    out_ref):                # packed output: (tile_n, 2H)
    h2_width = out_ref.shape[-1]             # 2H (actor lanes | critic lanes)
    h = h2_width // 2

    # Cast x to the MXU operand dtype *inside* the kernel (no extra HBM pass).
    x = x_ref[...].astype(w1_ref.dtype)      # (tile_n, K)

    # fused layer 1: one lane-dense (K -> 2H) matmul, f32 accumulate, f32 tanh
    h1 = jnp.tanh(
        jnp.dot(x, w1_ref[...], preferred_element_type=jnp.float32) + b1_ref[...])

    # fused layer 2: block-diagonal (2H -> 2H) matmul, f32 accumulate, f32 tanh
    h2 = jnp.tanh(
        jnp.dot(h1.astype(w2_ref.dtype), w2_ref[...],
                preferred_element_type=jnp.float32) + b2_ref[...])

    # value head: VPU multiply + lane reduction instead of a width-1 MXU matmul.
    # vw is zero on the actor half, so only the critic lanes contribute.
    v = jnp.sum(h2 * vw_ref[...], axis=-1, keepdims=True) + vb_ref[...]   # (tile_n, 1)

    # lane-dense packed store: lanes [0, H) = actor hidden, lanes [H, 2H) = value
    lane = jax.lax.broadcasted_iota(jnp.int32, h2.shape, 1)
    out_ref[...] = jnp.where(lane < h, h2, v).astype(out_ref.dtype)


# ------------------------------- wrapper -------------------------------------
def mlp_base_forward(x, fused, *, max_tile=1024, out_dtype=jnp.float32):
    """x: (N, K) float32. fused: dict from fuse_params(). Returns (value, hidden_actor)."""
    N, K = x.shape
    H2 = fused["w2"].shape[1]
    H = H2 // 2

    tile = _choose_tile(N, max_tile)
    grid = pl.cdiv(N, tile)                  # ragged trailing block handled by Pallas

    resident = lambda arr: pl.BlockSpec(arr.shape, lambda i: (0, 0))

    packed = pl.pallas_call(
        mlp_base_kernel,
        out_shape=jax.ShapeDtypeStruct((N, H2), out_dtype),
        grid_spec=pltpu.PrefetchScalarGridSpec(
            num_scalar_prefetch=0,
            grid=(grid,),
            in_specs=[
                pl.BlockSpec((tile, K), lambda i: (i, 0)),   # x: tiled over batch
                resident(fused["w1"]),                       # weights stay VMEM-resident
                resident(fused["b1"]),
                resident(fused["w2"]),
                resident(fused["b2"]),
                resident(fused["vw"]),
                resident(fused["vb"]),
            ],
            out_specs=pl.BlockSpec((tile, H2), lambda i: (i, 0)),
        ),
        compiler_params=pltpu.CompilerParams(
            dimension_semantics=("parallel",)),              # megacore / 2-TC sharding
    )(x, fused["w1"], fused["b1"], fused["w2"], fused["b2"],
      fused["vw"], fused["vb"])

    # These slices are expected to fuse into downstream consumers (no second
    # kernel output of width 64 / 1 -> avoids masked partial stores).
    hidden_actor = packed[:, :H]
    value = packed[:, H:H + 1]
    if out_dtype != jnp.float32:
        value = value.astype(jnp.float32)    # tiny (N,1) upcast for the critic baseline
    return value, hidden_actor


# ----------------------- deterministic parameter init -----------------------
def orthogonal_(key, shape, gain):
    """Mimics torch.nn.init.orthogonal_ for a 2-D (out, in) weight."""
    rows, cols = shape
    flat = jax.random.normal(key, (rows, cols), dtype=jnp.float32)
    transpose = rows < cols
    a = flat.T if transpose else flat
    q, r = jnp.linalg.qr(a)
    d = jnp.sign(jnp.diag(r))
    q = q * d[None, :]
    if transpose:
        q = q.T
    return gain * q[:rows, :cols]


def make_params(key, num_inputs, hidden_size):
    """Per-tower parameters, pre-transposed to (in, out) so forward is x @ W."""
    gain = float(np.sqrt(2.0))
    ks = jax.random.split(key, 5)
    aw1 = orthogonal_(ks[0], (hidden_size, num_inputs), gain).T
    aw2 = orthogonal_(ks[1], (hidden_size, hidden_size), gain).T
    cw1 = orthogonal_(ks[2], (hidden_size, num_inputs), gain).T
    cw2 = orthogonal_(ks[3], (hidden_size, hidden_size), gain).T
    vw = orthogonal_(ks[4], (1, hidden_size), gain).T          # (H, 1)
    zeros_h = jnp.zeros((1, hidden_size), jnp.float32)
    return {
        "aw1": aw1, "ab1": zeros_h, "aw2": aw2, "ab2": zeros_h,
        "cw1": cw1, "cb1": zeros_h, "cw2": cw2, "cb2": zeros_h,
        "vw": vw, "vb": jnp.zeros((1, 1), jnp.float32),
    }


def fuse_params(params, mxu_dtype=jnp.float32):
    """Fuse actor/critic towers into lane-dense kernel weights.

    mxu_dtype controls only the matmul operands (W1, W2; x is cast inside the
    kernel). bf16 operands are valid on all generations (v5e MXU is bf16
    native). Biases / value weights stay f32 (bias add, tanh and the value
    reduction run on the VPU/EUP in f32).

    NOTE: the block-diagonal layer-2 fusion only makes sense while 2H <= 128
    (one MXU tile); for hidden_size > 64 split w2 back into two HxH dots.
    """
    H = params["aw2"].shape[0]
    w1 = jnp.concatenate([params["aw1"], params["cw1"]], axis=1)       # (K, 2H)
    b1 = jnp.concatenate([params["ab1"], params["cb1"]], axis=1)       # (1, 2H)
    w2 = jnp.zeros((2 * H, 2 * H), jnp.float32)                        # block-diagonal
    w2 = w2.at[:H, :H].set(params["aw2"]).at[H:, H:].set(params["cw2"])
    b2 = jnp.concatenate([params["ab2"], params["cb2"]], axis=1)       # (1, 2H)
    vw = jnp.concatenate([jnp.zeros((1, H), jnp.float32),
                          params["vw"].reshape(1, H)], axis=1)         # (1, 2H)
    vb = params["vb"].reshape(1, 1)
    return {
        "w1": w1.astype(mxu_dtype), "b1": b1,
        "w2": w2.astype(mxu_dtype), "b2": b2,
        "vw": vw, "vb": vb,
    }


# ------------------------------ pure-JAX reference ---------------------------
def reference_forward(x, params):
    hp = jax.lax.Precision.HIGHEST
    ha = jnp.tanh(jnp.dot(x, params["aw1"], precision=hp) + params["ab1"])
    ha = jnp.tanh(jnp.dot(ha, params["aw2"], precision=hp) + params["ab2"])
    hc = jnp.tanh(jnp.dot(x, params["cw1"], precision=hp) + params["cb1"])
    hc = jnp.tanh(jnp.dot(hc, params["cw2"], precision=hp) + params["cb2"])
    v = jnp.dot(hc, params["vw"], precision=hp) + params["vb"]
    return v, ha


if __name__ == "__main__":
    num_inputs = 32  # observation features
    hidden = 64      # hidden_size (module default) -> fused width = 128 lanes

    key = jax.random.PRNGKey(0)
    k_x, k_p, k_x2 = jax.random.split(key, 3)
    params = make_params(k_p, num_inputs, hidden)

    # ---- small batch: single grid step, ragged (N not a multiple of 8) ------
    N = 20
    x = jax.random.normal(k_x, (N, num_inputs), dtype=jnp.float32)
    rnn_hxs = jnp.zeros((N, 1), jnp.float32)   # non-recurrent: passed through
    masks = jnp.ones((N, 1), jnp.float32)      # unused when not recurrent

    v_ref, ha_ref = reference_forward(x, params)

    fused_f32 = fuse_params(params, mxu_dtype=jnp.float32)
    value, hidden_actor = mlp_base_forward(x, fused_f32)
    value = jax.block_until_ready(value)
    hidden_actor = jax.block_until_ready(hidden_actor)
    np.testing.assert_allclose(np.asarray(value), np.asarray(v_ref),
                               rtol=1e-3, atol=1e-3)
    np.testing.assert_allclose(np.asarray(hidden_actor), np.asarray(ha_ref),
                               rtol=1e-3, atol=1e-3)

    # ---- multi-step grid (even step count) + ragged trailing block ----------
    N2 = 100
    x2 = jax.random.normal(k_x2, (N2, num_inputs), dtype=jnp.float32)
    v2_ref, ha2_ref = reference_forward(x2, params)
    v2, ha2 = mlp_base_forward(x2, fused_f32, max_tile=48)   # -> tile=32, 4 steps
    v2 = jax.block_until_ready(v2)
    ha2 = jax.block_until_ready(ha2)
    np.testing.assert_allclose(np.asarray(v2), np.asarray(v2_ref),
                               rtol=1e-3, atol=1e-3)
    np.testing.assert_allclose(np.asarray(ha2), np.asarray(ha2_ref),
                               rtol=1e-3, atol=1e-3)

    # ---- bf16 MXU operands + bf16 packed writeback (f32 in-kernel math) -----
    fused_bf16 = fuse_params(params, mxu_dtype=jnp.bfloat16)
    v16, ha16 = mlp_base_forward(x, fused_bf16, out_dtype=jnp.bfloat16)
    v16 = jax.block_until_ready(v16)
    ha16 = jax.block_until_ready(ha16)
    np.testing.assert_allclose(np.asarray(v16, dtype=np.float32),
                               np.asarray(v_ref), rtol=1e-1, atol=2e-1)
    np.testing.assert_allclose(np.asarray(ha16, dtype=np.float32),
                               np.asarray(ha_ref), rtol=1e-1, atol=2e-1)

    # full module output tuple: (critic_linear(critic(x)), actor(x), rnn_hxs)
    outputs = (value, hidden_actor, rnn_hxs)
    assert outputs[0].shape == (N, 1)
    assert outputs[1].shape == (N, hidden)
    assert outputs[2].shape == (N, 1)

    print("KERNEL_OK")
</pallas_src>

<mosaic_0001>
module attributes {stable_mosaic.version = 11 : i64} {
  func.func @mlp_base_kernel(%arg0: i32, %arg1: memref<24x32xf32, #tpu.memory_space<vmem>>, %arg2: memref<32x128xf32, #tpu.memory_space<vmem>>, %arg3: memref<1x128xf32, #tpu.memory_space<vmem>>, %arg4: memref<128x128xf32, #tpu.memory_space<vmem>>, %arg5: memref<1x128xf32, #tpu.memory_space<vmem>>, %arg6: memref<1x128xf32, #tpu.memory_space<vmem>>, %arg7: memref<1x1xf32, #tpu.memory_space<vmem>>, %arg8: memref<24x128xf32, #tpu.memory_space<vmem>>) attributes {dimension_semantics = [#tpu.dimension_semantics<parallel>], iteration_bounds = array<i64: 1>, scalar_prefetch = 0 : i64, scratch_operands = 0 : i64, tpu.core_type = #tpu.core_type<tc>, window_params = [{transform_indices = @transform_0, window_bounds = array<i64: 24, 32>}, {pipeline_mode = #tpu.pipeline_mode<synchronous>, transform_indices = @transform_1, window_bounds = array<i64: 32, 128>}, {pipeline_mode = #tpu.pipeline_mode<synchronous>, transform_indices = @transform_2, window_bounds = array<i64: 1, 128>}, {pipeline_mode = #tpu.pipeline_mode<synchronous>, transform_indices = @transform_3, window_bounds = array<i64: 128, 128>}, {pipeline_mode = #tpu.pipeline_mode<synchronous>, transform_indices = @transform_4, window_bounds = array<i64: 1, 128>}, {pipeline_mode = #tpu.pipeline_mode<synchronous>, transform_indices = @transform_5, window_bounds = array<i64: 1, 128>}, {pipeline_mode = #tpu.pipeline_mode<synchronous>, transform_indices = @transform_6, window_bounds = array<i64: 1, 1>}, {transform_indices = @transform_7, window_bounds = array<i64: 24, 128>}]} {
    %c0 = arith.constant 0 : index
    %c0_0 = arith.constant 0 : index
    %0 = vector.load %arg1[%c0, %c0_0] : memref<24x32xf32, #tpu.memory_space<vmem>>, vector<24x32xf32>
    %c0_1 = arith.constant 0 : index
    %c0_2 = arith.constant 0 : index
    %1 = vector.load %arg2[%c0_1, %c0_2] : memref<32x128xf32, #tpu.memory_space<vmem>>, vector<32x128xf32>
    %cst = arith.constant dense<0.000000e+00> : vector<24x128xf32>
    %2 = tpu.matmul %0, %1, %cst {dimension_numbers = #tpu.dot_dimension_numbers<[1], [0], [0], [1], [0, 0, 1, 1], [], []>} : vector<24x32xf32>, vector<32x128xf32>, vector<24x128xf32> -> vector<24x128xf32>
    %c0_3 = arith.constant 0 : index
    %c0_4 = arith.constant 0 : index
    %3 = vector.load %arg3[%c0_3, %c0_4] : memref<1x128xf32, #tpu.memory_space<vmem>>, vector<1x128xf32>
    %4 = vector.broadcast %3 : vector<1x128xf32> to vector<24x128xf32>
    %5 = arith.addf %2, %4 : vector<24x128xf32>
    %6 = math.tanh %5 : vector<24x128xf32>
    %c0_5 = arith.constant 0 : index
    %c0_6 = arith.constant 0 : index
    %7 = vector.load %arg4[%c0_5, %c0_6] : memref<128x128xf32, #tpu.memory_space<vmem>>, vector<128x128xf32>
    %cst_7 = arith.constant dense<0.000000e+00> : vector<24x128xf32>
    %8 = tpu.matmul %6, %7, %cst_7 {dimension_numbers = #tpu.dot_dimension_numbers<[1], [0], [0], [1], [0, 0, 1, 1], [], []>} : vector<24x128xf32>, vector<128x128xf32>, vector<24x128xf32> -> vector<24x128xf32>
    %c0_8 = arith.constant 0 : index
    %c0_9 = arith.constant 0 : index
    %9 = vector.load %arg5[%c0_8, %c0_9] : memref<1x128xf32, #tpu.memory_space<vmem>>, vector<1x128xf32>
    %10 = vector.broadcast %9 : vector<1x128xf32> to vector<24x128xf32>
    %11 = arith.addf %8, %10 : vector<24x128xf32>
    %12 = math.tanh %11 : vector<24x128xf32>
    %c0_10 = arith.constant 0 : index
    %c0_11 = arith.constant 0 : index
    %13 = vector.load %arg6[%c0_10, %c0_11] : memref<1x128xf32, #tpu.memory_space<vmem>>, vector<1x128xf32>
    %14 = vector.broadcast %13 : vector<1x128xf32> to vector<24x128xf32>
    %15 = arith.mulf %12, %14 : vector<24x128xf32>
    %cst_12 = arith.constant dense<0.000000e+00> : vector<24xf32>
    %16 = vector.multi_reduction <add>, %15, %cst_12 [1] : vector<24x128xf32> to vector<24xf32>
    %17 = vector.shape_cast %16 : vector<24xf32> to vector<24x1xf32>
    %c0_13 = arith.constant 0 : index
    %c0_14 = arith.constant 0 : index
    %18 = vector.load %arg7[%c0_13, %c0_14] : memref<1x1xf32, #tpu.memory_space<vmem>>, vector<1x1xf32>
    %19 = vector.broadcast %18 : vector<1x1xf32> to vector<24x1xf32>
    %20 = arith.addf %17, %19 : vector<24x1xf32>
    %21 = tpu.iota {dimensions = array<i32: 1>} : vector<24x128xi32>
    %c64_i32 = arith.constant 64 : i32
    %22 = vector.broadcast %c64_i32 : i32 to vector<24x128xi32>
    %23 = arith.cmpi slt, %21, %22 : vector<24x128xi32>
    %24 = vector.shape_cast %20 : vector<24x1xf32> to vector<24x1xf32>
    %25 = vector.broadcast %24 : vector<24x1xf32> to vector<24x128xf32>
    %26 = arith.select %23, %12, %25 : vector<24x128xi1>, vector<24x128xf32>
    %c0_15 = arith.constant 0 : index
    %c0_16 = arith.constant 0 : index
    %27 = vector.load %arg8[%c0_15, %c0_16] : memref<24x128xf32, #tpu.memory_space<vmem>>, vector<24x128xf32>
    tpu.vector_store %arg8[%c0_15, %c0_16], %26 {strides = array<i32>} : memref<24x128xf32, #tpu.memory_space<vmem>>, vector<24x128xf32>,
    return
  }
  func.func @transform_0(%arg0: i32) -> (i32, i32) {
    %c0_i32 = arith.constant 0 : i32
    %c0_i32_0 = arith.constant 0 : i32
    return %arg0, %c0_i32 : i32, i32
  }
  func.func @transform_1(%arg0: i32) -> (i32, i32) {
    %c0_i32 = arith.constant 0 : i32
    %c0_i32_0 = arith.constant 0 : i32
    %c0_i32_1 = arith.constant 0 : i32
    return %c0_i32, %c0_i32_0 : i32, i32
  }
  func.func @transform_2(%arg0: i32) -> (i32, i32) {
    %c0_i32 = arith.constant 0 : i32
    %c0_i32_0 = arith.constant 0 : i32
    %c0_i32_1 = arith.constant 0 : i32
    return %c0_i32, %c0_i32_0 : i32, i32
  }
  func.func @transform_3(%arg0: i32) -> (i32, i32) {
    %c0_i32 = arith.constant 0 : i32
    %c0_i32_0 = arith.constant 0 : i32
    %c0_i32_1 = arith.constant 0 : i32
    return %c0_i32, %c0_i32_0 : i32, i32
  }
  func.func @transform_4(%arg0: i32) -> (i32, i32) {
    %c0_i32 = arith.constant 0 : i32
    %c0_i32_0 = arith.constant 0 : i32
    %c0_i32_1 = arith.constant 0 : i32
    return %c0_i32, %c0_i32_0 : i32, i32
  }
  func.func @transform_5(%arg0: i32) -> (i32, i32) {
    %c0_i32 = arith.constant 0 : i32
    %c0_i32_0 = arith.constant 0 : i32
    %c0_i32_1 = arith.constant 0 : i32
    return %c0_i32, %c0_i32_0 : i32, i32
  }
  func.func @transform_6(%arg0: i32) -> (i32, i32) {
    %c0_i32 = arith.constant 0 : i32
    %c0_i32_0 = arith.constant 0 : i32
    %c0_i32_1 = arith.constant 0 : i32
    return %c0_i32, %c0_i32_0 : i32, i32
  }
  func.func @transform_7(%arg0: i32) -> (i32, i32) {
    %c0_i32 = arith.constant 0 : i32
    %c0_i32_0 = arith.constant 0 : i32
    return %arg0, %c0_i32 : i32, i32
  }
}

</mosaic_0001>

<bundles_post_ra>
// kernel: tpu_custom_call.1
= control target key start
LH: loop header
LB: loop body
LE: loop exit
PB: predicated region body
PF: predicated region fallthrough
CT: control target
= control target key end

     0   :  { %s734_s0 = inlined_call_operand.hbm [shape: f32[20,32], index: 0, kind: input, shape index: {}]   ;;  %s735_s1 = inlined_call_operand.hbm [shape: f32[32,128], index: 1, kind: input, shape index: {}]   ;;  %s736_s2 = inlined_call_operand.vmem [shape: f32[1,128], index: 2, kind: input, shape index: {}]   ;;  %s737_s3 = inlined_call_operand.hbm [shape: f32[128,128], index: 3, kind: input, shape index: {}]   ;;  %s738_s4 = inlined_call_operand.vmem [shape: f32[1,128], index: 4, kind: input, shape index: {}]   ;;  %s739_s5 = inlined_call_operand.vmem [shape: f32[1,128], index: 5, kind: input, shape index: {}]   ;;  %s740_s6 = inlined_call_operand.<no memory space> [shape: f32[1,1], index: 6, kind: input, shape index: {}]   ;;  %s741_s7 = inlined_call_operand.hbm [shape: f32[20,128], index: 7, kind: output, shape index: {}]  }
   0x1   :  { %v12_v0 = vstv %s740_s6 }
   0x2   :  { %13 = vst [vmem:[#allocation2] sm:$0x1] %v12_v0 }
   0x3   :  { %14 = vsyncpa [#allocation4], 0 }
   0x4   :  { %15 = vsyncpa [#allocation7], 0 }
   0x5   :  { %16 = vsyncpa [#allocation5], 0  ;;  %s590_s26 = smov [#allocation6]   ;;  %s591_s28 = smov [#allocation3]  }
   0x6   :  { %s34_s27 = sshll.u32 %s590_s26, 4  ;;  %s22_s29 = sshll.u32 %s591_s28, 4  ;;  %s35_s27 = int_to_ptr.vmem [resolvable:$true] %s34_s27  ;;  %s643_s29 = int_to_ptr.vmem [resolvable:$true] %s22_s29 }
   0x7   :  { %s496_s9 = scalar_lea.hbm %s735_s1, 512 }
   0x8   :  { %p497_p0 = scmp.ne.s32.totalorder %s735_s1, %s496_s9  ;;  %p500_p1 = scmp.lt.u32.totalorder %s496_s9, %s735_s1 }
   0xa   :  { %p502_p2 = pnand %p500_p1, %p497_p0 }
   0xc   :  { %505 = shalt.err (!%p502_p2)
}
   0xd   :  { %s506_s13 = scalar_lea.vmem %s35_s27, 512  ;;  %p511_p4 = scmp.lt.s32.totalorder %s35_s27, %s35_s27 }
   0xe   :  { %p507_p3 = scmp.ne.s32.totalorder %s35_s27, %s506_s13  ;;  %p512_p5 = scmp.lt.s32.totalorder %s506_s13, %s506_s13 }
  0x10   :  { %p513_p6 = por %p512_p5, %p511_p4 }
  0x12   :  { %p514_p7 = pnand %p513_p6, %p507_p3 }
  0x14   :  { %517 = shalt.err (!%p514_p7)
}
  0x15   :  { %s592_s14 = smov 128   ;;  %s593_s15 = smov 8  }
  0x16   :  { %40 = dma.hbm_to_vmem [thread:$0]  %s735_s1, 512, %s35_s27, [#allocation7], %s592_s14, %s592_s14, %s593_s15  }
  0x17   :  { %s518_s20 = scalar_lea.hbm %s734_s0, 384 }
  0x18   :  { %p519_p8 = scmp.ne.s32.totalorder %s734_s0, %s518_s20  ;;  %p522_p9 = scmp.lt.u32.totalorder %s518_s20, %s734_s0 }
  0x1a   :  { %p524_p10 = pnand %p522_p9, %p519_p8 }
  0x1c   :  { %527 = shalt.err (!%p524_p10)
}
  0x1d   :  { %s528_s25 = scalar_lea.vmem %s643_s29, 384  ;;  %p533_p12 = scmp.lt.s32.totalorder %s643_s29, %s643_s29 }
  0x1e   :  { %p529_p11 = scmp.ne.s32.totalorder %s643_s29, %s528_s25  ;;  %p534_p13 = scmp.lt.s32.totalorder %s528_s25, %s528_s25 }
  0x20   :  { %p535_p0 = por %p534_p13, %p533_p12 }
  0x22   :  { %p536_p1 = pnand %p535_p0, %p529_p11 }
  0x24   :  { %539 = shalt.err (!%p536_p1)
}
  0x25   :  { %28 = dma.hbm_to_vmem [thread:$0]  %s734_s0, 384, %s643_s29, [#allocation4], %s592_s14, %s592_s14, %s593_s15  }
  0x26   :  { %s594_s27 = smov [#allocation8]   ;;  %s540_s9 = scalar_lea.hbm %s737_s3, 2048 }
  0x27   :  { %s48_s28 = sshll.u32 %s594_s27, 4  ;;  %p541_p2 = scmp.ne.s32.totalorder %s737_s3, %s540_s9  ;;  %s49_s28 = int_to_ptr.vmem [resolvable:$true] %s48_s28 }
  0x28   :  { %p544_p3 = scmp.lt.u32.totalorder %s540_s9, %s737_s3 }
  0x2a   :  { %p546_p4 = pnand %p544_p3, %p541_p2 }
  0x2c   :  { %549 = shalt.err (!%p546_p4)
}
  0x2d   :  { %s550_s13 = scalar_lea.vmem %s49_s28, 2048  ;;  %p555_p6 = scmp.lt.s32.totalorder %s49_s28, %s49_s28 }
  0x2e   :  { %p551_p5 = scmp.ne.s32.totalorder %s49_s28, %s550_s13  ;;  %p556_p7 = scmp.lt.s32.totalorder %s550_s13, %s550_s13 }
  0x30   :  { %p557_p8 = por %p556_p7, %p555_p6 }
  0x32   :  { %p558_p9 = pnand %p557_p8, %p551_p5 }
  0x34   :  { %561 = shalt.err (!%p558_p9)
}
  0x35   :  { %54 = dma.hbm_to_vmem [thread:$0]  %s737_s3, 2048, %s49_s28, [#allocation7], %s592_s14, %s592_s14, %s593_s15  }
  0x36   :  { %584 = dma.done.wait [#allocation4], 384  }
  0x37   :  { %585 = vsyncadd [#allocation4], 4294966912 }
  0x38   :  { %586 = dma.done.wait [#allocation7], 2560  }
  0x39   :  { %587 = vsyncadd [#allocation7], 4294964736  ;;  %v595_v1 = vmov 0.0|0.0   ;;  %vm596_vm0 = vmmov 0   ;;  %v597_v2 = vmov 0.0   ;;  %v73_v3 = vld [vmem:[#allocation6] sm:$0xff] }
  0x3a   :  { %442 = vmatprep.subr.bf16.mxu0 %v595_v1  ;;  %392 = vmatprep.mubr.msk.f32.mxu0 %vm596_vm0, %v597_v2  ;;  %v74_v4 = vld [vmem:[#allocation6 + $0x8] sm:$0xff]  ;;  %v75_v5 = vld [vmem:[#allocation6 + $0x10] sm:$0xff]  ;;  %v76_v7 = vld [vmem:[#allocation6 + $0x18] sm:$0xff]  ;;  %vm84_vm1 = vcmask 261120  }
  0x3b   :  { %448 = vmatprep.subr.bf16.mxu1 %v595_v1  ;;  %433 = vmatprep.mubr.msk.f32.mxu1 %vm596_vm0, %v597_v2  ;;  %v443_v6 = vpack.c.bf16 %v74_v4, %v73_v3  ;;  %v177_v8 = vld [vmem:[#allocation8] sm:$0xff]  ;;  %v178_v9 = vld [vmem:[#allocation8 + $0x8] sm:$0xff]  ;;  %v446_v10 = vpack.c.bf16 %v76_v7, %v75_v5  ;;  %v179_v12 = vld [vmem:[#allocation8 + $0x10] sm:$0xff] }
  0x3c   :  { %v449_v11 = vpack.c.bf16 %v178_v9, %v177_v8  ;;  %v180_v13 = vld [vmem:[#allocation8 + $0x18] sm:$0xff]  ;;  %v181_v15 = vld [vmem:[#allocation8 + $0x20] sm:$0xff]  ;;  %v182_v16 = vld [vmem:[#allocation8 + $0x28] sm:$0xff] }
  0x3d   :  { %444 = vmatpush3.bf16.msra.mxu0 %v443_v6  ;;  %v452_v14 = vpack.c.bf16 %v180_v13, %v179_v12  ;;  %v70_v17 = vld [vmem:[#allocation3] sm:$0xff]  ;;  %v455_v18 = vpack.c.bf16 %v182_v16, %v181_v15  ;;  %v183_v19 = vld [vmem:[#allocation8 + $0x30] sm:$0xff]  ;;  %v184_v20 = vld [vmem:[#allocation8 + $0x38] sm:$0xff] }
  0x3e   :  { %445 = vmatprep.subr.bf16.mxu0 %v595_v1  ;;  %450 = vmatpush3.bf16.msra.mxu1 %v449_v11  ;;  %v71_v21 = vld [vmem:[#allocation3 + $0x8] sm:$0xff]  ;;  %v458_v22 = vpack.c.bf16 %v184_v20, %v183_v19  ;;  %v185_v23 = vld [vmem:[#allocation8 + $0x40] sm:$0xff]  ;;  %v186_v24 = vld [vmem:[#allocation8 + $0x48] sm:$0xff] }
  0x3f   :  { %451 = vmatprep.subr.bf16.mxu1 %v595_v1  ;;  %v72_v25 = vld [vmem:[#allocation3 + $0x10] sm:$0xff]  ;;  %v461_v26 = vpack.c.bf16 %v186_v24, %v185_v23  ;;  %v187_v27 = vld [vmem:[#allocation8 + $0x50] sm:$0xff]  ;;  %v189_v30 = vld [vmem:[#allocation8 + $0x60] sm:$0xff] }
  0x40   :  { %v188_v28 = vld [vmem:[#allocation8 + $0x58] sm:$0xff]  ;;  %v190_v31 = vld [vmem:[#allocation8 + $0x68] sm:$0xff]  ;;  %v191_v33 = vld [vmem:[#allocation8 + $0x70] sm:$0xff] }
  0x41   :  { %447 = vmatpush3.bf16.msra.mxu0 %v446_v10  ;;  %v464_v29 = vpack.c.bf16 %v188_v28, %v187_v27  ;;  %v467_v32 = vpack.c.bf16 %v190_v31, %v189_v30  ;;  %v192_v34 = vld [vmem:[#allocation8 + $0x78] sm:$0xff]  ;;  %v351_v36 = vld [vmem:[%s736_s2] ss:$0 sm:$0xff]  ;;  %v309_v10 = vlaneseq }
  0x42   :  { %453 = vmatpush3.bf16.msra.mxu1 %v452_v14  ;;  %v470_v35 = vpack.c.bf16 %v192_v34, %v191_v33  ;;  %v355_v49 = vld [vmem:[%s738_s4] ss:$0 sm:$0xff]  ;;  %s599_s4 = smov [#allocation9]  }
  0x43   :  { %454 = vmatprep.subr.bf16.mxu1 %v595_v1  ;;  %v356_v59 = vld [vmem:[%s739_s5] ss:$0 sm:$0xff]  ;;  %v310_v11 = vand.u32 127, %v309_v10  ;;  %s338_s5 = sshll.u32 %s599_s4, 4  ;;  %s339_s5 = int_to_ptr.vmem [resolvable:$true] %s338_s5 }
  0x44   :  { %393 = vmatmul.mubr.msk.f32.vlgmr.msra.gmra.mrb[0].mxu0 %vm84_vm1, %v70_v17  ;;  %v357_v3 = vld [vmem:[#allocation2] ss:$0 sm:$0xff]  ;;  %s562_s20 = scalar_lea.vmem %s339_s5, 384  ;;  %p567_p11 = scmp.lt.s32.totalorder %s339_s5, %s339_s5 }
  0x45   :  { %395 = vmatprep.mubr.msk.f32.mxu0 %vm596_vm0, %v597_v2  ;;  %vm311_vm2 = vcmp.lt.s32.totalorder %v310_v11, 64  ;;  %p563_p10 = scmp.ne.s32.totalorder %s339_s5, %s562_s20  ;;  %p568_p12 = scmp.lt.s32.totalorder %s562_s20, %s562_s20 }
  0x46   :  { %456 = vmatpush3.bf16.msra.mxu1 %v455_v18 }
  0x47   :  { %457 = vmatprep.subr.bf16.mxu1 %v595_v1  ;;  %p569_p13 = por %p568_p12, %p567_p11 }
  0x48   :  { %396 = vmatmul.mubr.msk.f32.gmra.mrb[2].mxu0 %vm84_vm1, %v71_v21 }
  0x49   :  { %398 = vmatprep.mubr.msk.f32.mxu0 %vm596_vm0, %v597_v2  ;;  %p570_p0 = pnand %p569_p13, %p563_p10 }
  0x4a   :  { %459 = vmatpush3.bf16.msra.mxu1 %v458_v22 }
  0x4b   :  { %460 = vmatprep.subr.bf16.mxu1 %v595_v1 }
  0x4c   :  { %399 = vmatmul.mubr.msk.f32.gmra.mrb[4].mxu0 %vm84_vm1, %v72_v25 }
  0x4e   :  { %462 = vmatpush3.bf16.msra.mxu1 %v461_v26 }
  0x4f   :  { %463 = vmatprep.subr.bf16.mxu1 %v595_v1 }
  0x52   :  { %465 = vmatpush3.bf16.msra.mxu1 %v464_v29 }
  0x53   :  { %466 = vmatprep.subr.bf16.mxu1 %v595_v1 }
  0x56   :  { %468 = vmatpush3.bf16.msra.mxu1 %v467_v32 }
  0x57   :  { %469 = vmatprep.subr.bf16.mxu1 %v595_v1 }
  0x5a   :  { %471 = vmatpush3.bf16.msra.mxu1 %v470_v35 }
 0x117   :  { %v160_v37 = vpop.f32.mrb[0].mxu0 }
 0x118   :  { %v161_v38 = vadd.f32 %v351_v36, %v160_v37  ;;  %v394_v39 = vpop.f32.mrb[1].mxu0 }
 0x11a   :  { %484 = vtanh.f32 %v161_v38 }
 0x11b   :  { %v165_v40 = vpop.f32.mrb[2].mxu0 }
 0x11c   :  { %v166_v41 = vadd.f32 %v351_v36, %v165_v40  ;;  %v397_v42 = vpop.f32.mrb[3].mxu0 }
 0x11e   :  { %486 = vtanh.f32 %v166_v41 }
 0x11f   :  { %v170_v43 = vpop.f32.mrb[4].mxu0 }
 0x120   :  { %v171_v44 = vadd.f32 %v351_v36, %v170_v43  ;;  %v400_v45 = vpop.f32.mrb[5].mxu0 }
 0x122   :  { %488 = vtanh.f32 %v171_v44 }
 0x124   :  { %v485_v46 = vpop.eup %484 }
 0x125   :  { %434 = vmatmul.mubr.f32.vlgmr.msra.gmra.mrb[0].mxu1 %v485_v46 }
 0x126   :  { %436 = vmatprep.mubr.msk.f32.mxu1 %vm596_vm0, %v597_v2 }
 0x128   :  { %v487_v47 = vpop.eup %486 }
 0x129   :  { %437 = vmatmul.mubr.f32.gmra.mrb[2].mxu1 %v487_v47 }
 0x12a   :  { %439 = vmatprep.mubr.msk.f32.mxu1 %vm596_vm0, %v597_v2  ;;  %v598_v2 = vmov 0  }
 0x12b   :  { %482 = vset.pattern.permute.xlu1 %v598_v2  ;;  %483 = vset.pattern.permute.xlu0 %v598_v2 }
 0x12c   :  { %v489_v48 = vpop.eup %488 }
 0x12d   :  { %440 = vmatmul.mubr.f32.gmra.mrb[4].mxu1 %v489_v48 }
 0x1f8   :  { %v266_v50 = vpop.f32.mrb[0].mxu1 }
 0x1f9   :  { %v267_v51 = vadd.f32 %v355_v49, %v266_v50  ;;  %v435_v52 = vpop.f32.mrb[1].mxu1 }
 0x1fb   :  { %490 = vtanh.f32 %v267_v51 }
 0x1fc   :  { %v271_v53 = vpop.f32.mrb[2].mxu1 }
 0x1fd   :  { %v272_v54 = vadd.f32 %v355_v49, %v271_v53  ;;  %v438_v55 = vpop.f32.mrb[3].mxu1 }
 0x1ff   :  { %492 = vtanh.f32 %v272_v54 }
 0x200   :  { %v276_v56 = vpop.f32.mrb[4].mxu1 }
 0x201   :  { %v277_v57 = vadd.f32 %v355_v49, %v276_v56  ;;  %v441_v58 = vpop.f32.mrb[5].mxu1 }
 0x203   :  { %494 = vtanh.f32 %v277_v57 }
 0x205   :  { %v491_v60 = vpop.eup %490 }
 0x206   :  { %v290_v61 = vmul.f32 %v491_v60, %v356_v59 }
 0x208   :  { %293 = vadd.xlane.f32.xlu0 %v290_v61 }
 0x209   :  { %v493_v62 = vpop.eup %492 }
 0x20a   :  { %v291_v63 = vmul.f32 %v493_v62, %v356_v59 }
 0x20c   :  { %295 = vadd.xlane.f32.xlu0 %v291_v63 }
 0x20d   :  { %v495_v0 = vpop.eup %494 }
 0x20e   :  { %v292_v1 = vmul.f32 %v495_v0, %v356_v59 }
 0x210   :  { %297 = vadd.xlane.f32.xlu1 %v292_v1 }
 0x295   :  { %v294_v4 = vpop.xlane.xlu0 %293 }
 0x296   :  { %v306_v5 = vadd.f32 %v357_v3, %v294_v4 }
 0x298   :  { %314 = vperm.xlu1 %482, %v306_v5  }
 0x299   :  { %v296_v6 = vpop.xlane.xlu0 %295 }
 0x29a   :  { %v307_v7 = vadd.f32 %v357_v3, %v296_v6 }
 0x29c   :  { %319 = vperm.xlu0 %483, %v307_v7  }
 0x29d   :  { %v298_v8 = vpop.xlane.xlu1 %297 }
 0x29e   :  { %v308_v9 = vadd.f32 %v357_v3, %v298_v8 }
 0x2a0   :  { %324 = vperm.xlu1 %482, %v308_v9  }
 0x317   :  { %v315_v12 = vpop.permute.xlu1 %314 }
 0x318   :  { %v327_v13 = vsel %vm311_vm2, %v491_v60, %v315_v12 }
 0x319   :  { %330 = vst [vmem:[#allocation9] sm:$0xff] %v327_v13 }
 0x31b   :  { %v320_v14 = vpop.permute.xlu0 %319 }
 0x31c   :  { %v328_v15 = vsel %vm311_vm2, %v493_v62, %v320_v14 }
 0x31d   :  { %331 = vst [vmem:[#allocation9 + $0x8] sm:$0xff] %v328_v15 }
 0x31f   :  { %v325_v16 = vpop.permute.xlu1 %324 }
 0x320   :  { %v329_v17 = vsel %vm311_vm2, %v495_v0, %v325_v16 }
 0x321   :  { %332 = vst [vmem:[#allocation9 + $0x10] sm:$0xff] %v329_v17 }
 0x322   :  { %573 = shalt.err (!%p570_p0)
}
 0x323   :  { %s574_s23 = scalar_lea.hbm %s741_s7, 384 }
 0x324   :  { %p575_p1 = scmp.ne.s32.totalorder %s741_s7, %s574_s23  ;;  %p578_p2 = scmp.lt.u32.totalorder %s574_s23, %s741_s7 }
 0x326   :  { %p580_p3 = pnand %p578_p2, %p575_p1 }
 0x328   :  { %583 = shalt.err (!%p580_p3)
}
 0x329   :  { %344 = dma.vmem_to_hbm [thread:$0]  %s339_s5, 384, %s741_s7, [#allocation5], %s592_s14, %s592_s14, %s593_s15  }
 0x32a   :  { %588 = dma.done.wait [#allocation5], 384  }
 0x32b   :  { %589 = vsyncadd [#allocation5], 4294966912 }
 0x32c   :  { %348 = vsyncpa [#allocation4], 1 }
 0x32d   :  { %349 = vsyncpa [#allocation7], 1 }
 0x32e   :  { %350 = vsyncpa [#allocation5], 1 }

</bundles_post_ra>
